<compile_context>
chip_gen: v7x
topology: tpu7x:2x2x1
jax: 0.10.0
libtpu: 0.0.40
codegen_flags: <defaults>
</compile_context>

<pallas_src>
import jax
import jax.numpy as jnp
from jax.experimental import pallas as pl
from jax.experimental.pallas import tpu as pltpu


def _rational_kernel(x_ref, mole_ref, deno_ref, o_ref):
    # x_ref:    (I, TILE_B)       un-replicated input tile, batch on the lane axis
    # mole_ref: (M+1, O, I, 1)    weight- and tanh_range-folded numerator coeffs
    # deno_ref: (D,   O, I, 1)    tanh_range-folded denominator coeffs
    # o_ref:    (O, TILE_B)       lane-dense output (batch on lanes)
    mole_order = mole_ref.shape[0] - 1
    deno_order = deno_ref.shape[0]
    O = mole_ref.shape[1]
    I, TB = x_ref.shape

    # tanh on the un-replicated slab (EUP); tanh_range is folded into the coeffs.
    xt = jnp.tanh(x_ref[...])                               # (I, TB)
    # O-fold replication is a leading-dim vreg broadcast (hoisted, reused below).
    xb = jnp.broadcast_to(xt[None, :, :], (O, I, TB))       # (O, I, TB)

    # Numerator: Horner evaluation; weights already folded into coefficients.
    mole = jnp.broadcast_to(mole_ref[mole_order], (O, I, TB))
    for k in range(mole_order - 1, -1, -1):
        mole = mole * xb + mole_ref[k]                       # (O,I,1) lane-broadcast

    # Denominator: |poly(x) * x| + 1  (tanh_range folded as d_k * tr^(k+1)).
    deno = jnp.broadcast_to(deno_ref[deno_order - 1], (O, I, TB))
    for k in range(deno_order - 2, -1, -1):
        deno = deno * xb + deno_ref[k]
    deno = jnp.abs(deno * xb) + 1.0

    # Divide via EUP reciprocal (approx=False keeps ~f32 accuracy).
    transformed = mole * pl.reciprocal(deno, approx=False)   # (O, I, TB)

    # 'boi,oi->bo' (weights folded) == exact-f32 segmented sum over I (XLU).
    o_ref[...] = jnp.sum(transformed, axis=1)                # (O, TB), lane-dense


def prepare_rational_params(weights, mole_coefs, deno_coefs, tanh_range):
    """Parameter-only preprocessing — run ONCE at layer init (hoisted out of
    the per-forward path). Folds `weights` and `tanh_range` into the rational
    coefficients so the kernel needs neither an MXU selector matmul nor a
    per-element tanh_range multiply."""
    Mp1, O, I = mole_coefs.shape
    D = deno_coefs.shape[0]
    tr = jnp.asarray(tanh_range, jnp.float32).reshape(())

    # tr_pow[k] = tr**k, built by repeated multiplication (sign-safe).
    n = max(Mp1 - 1, D)
    tr_pow = jnp.concatenate(
        [jnp.ones((1,), jnp.float32), jnp.cumprod(jnp.full((n,), tr, jnp.float32))])

    mole_folded = (mole_coefs.astype(jnp.float32)
                   * tr_pow[:Mp1, None, None]
                   * weights.astype(jnp.float32)[None])       # (M+1, O, I)
    deno_folded = deno_coefs.astype(jnp.float32) * tr_pow[1:D + 1, None, None]

    # Trailing unit lane dim so in-kernel broadcasts are plain lane splats.
    return mole_folded[..., None], deno_folded[..., None]     # (..., O, I, 1)


def custom_rational_layer_forward(x, mole_folded, deno_folded, *, tile_b=128):
    """Per-call forward: x (B, I) -> (B, O). `mole_folded`/`deno_folded` come
    from prepare_rational_params (computed once, not per call)."""
    B, I = x.shape
    Mp1, O, _, _ = mole_folded.shape
    D = deno_folded.shape[0]

    # For real batches pick tile_b 512-1024 on v5e/v6e, ~256-512 on v7x
    # (64 MiB physical / 32 MiB scoped VMEM); 128 is plenty for the toy shapes.
    num_tiles = (B + tile_b - 1) // tile_b
    Bp = num_tiles * tile_b

    # Put batch on the 128-lane axis; pad with zeros (tanh(0)=0 -> deno=1, finite).
    x_t = jnp.pad(x.astype(jnp.float32).T, ((0, 0), (0, Bp - B)))   # (I, Bp)

    out = pl.pallas_call(
        _rational_kernel,
        out_shape=jax.ShapeDtypeStruct((O, Bp), jnp.float32),
        grid_spec=pltpu.PrefetchScalarGridSpec(
            num_scalar_prefetch=0,
            grid=(num_tiles,),
            in_specs=[
                # un-replicated x tile: batch on lanes, streamed per grid step
                pl.BlockSpec((I, tile_b), lambda b: (0, b)),
                # grid-invariant coefficient blocks (DMA'd once, stay in VMEM)
                pl.BlockSpec((Mp1, O, I, 1), lambda b: (0, 0, 0, 0)),
                pl.BlockSpec((D, O, I, 1), lambda b: (0, 0, 0, 0)),
            ],
            out_specs=pl.BlockSpec((O, tile_b), lambda b: (0, b)),
        ),
        compiler_params=pltpu.CompilerParams(
            dimension_semantics=("parallel",),          # 2 TCs on v7x, no-op on v5e/v6e
            vmem_limit_bytes=32 * 1024 * 1024,          # within scoped limit on all chips
        ),
    )(x_t, mole_folded, deno_folded)

    return out[:, :B].T                                  # (B, O)


def reference(x, weights, mole_coefs, deno_coefs, tanh_range):
    # Pure-JAX reference mirroring the PyTorch forward (exact f32, no MXU).
    B = x.shape[0]
    xs = jnp.tanh(x) * tanh_range                        # (B, I)
    xb = xs[:, None, :]                                  # (B, 1, I)
    M = mole_coefs.shape[0] - 1
    D = deno_coefs.shape[0]
    mole = jnp.broadcast_to(mole_coefs[M][None], (B,) + weights.shape).astype(jnp.float32)
    for k in range(M - 1, -1, -1):
        mole = mole * xb + mole_coefs[k]
    deno = jnp.broadcast_to(deno_coefs[D - 1][None], (B,) + weights.shape).astype(jnp.float32)
    for k in range(D - 2, -1, -1):
        deno = deno * xb + deno_coefs[k]
    deno = jnp.abs(deno * xb) + 1.0
    transformed = mole / deno                            # (B, O, I)
    return jnp.sum(transformed * weights[None], axis=-1)  # 'boi,oi->bo' in f32


if __name__ == "__main__":
    # Module hyperparameters (small, consistent with the forward pass).
    batch = 4
    input_size = 8
    output_size = 16
    mole_order = 3
    deno_order = 2

    key = jax.random.PRNGKey(0)
    kx, kw, km, kd = jax.random.split(key, 4)

    x = jax.random.normal(kx, (batch, input_size), dtype=jnp.float32)
    weights = jax.random.normal(kw, (output_size, input_size), dtype=jnp.float32)
    # One RationalBasisFunction per (output, input) pair, stacked:
    mole_coefs = 0.1 * jax.random.normal(
        km, (mole_order + 1, output_size, input_size), dtype=jnp.float32)
    deno_coefs = 0.1 * jax.random.normal(
        kd, (deno_order, output_size, input_size), dtype=jnp.float32)
    tanh_range = jnp.float32(1.0)

    # Parameter folding happens once (init-time), not per forward call.
    mole_folded, deno_folded = prepare_rational_params(
        weights, mole_coefs, deno_coefs, tanh_range)

    fwd = jax.jit(custom_rational_layer_forward)
    out = jax.block_until_ready(fwd(x, mole_folded, deno_folded))

    ref = reference(x, weights, mole_coefs, deno_coefs, tanh_range)
    assert out.shape == (batch, output_size)
    assert jnp.allclose(out, ref, atol=2e-5, rtol=2e-5), "mismatch vs reference"

    print("KERNEL_OK")
</pallas_src>

<mosaic_0001>
module attributes {stable_mosaic.version = 11 : i64} {
  func.func @_rational_kernel(%arg0: i32, %arg1: memref<8x128xf32, #tpu.memory_space<vmem>>, %arg2: memref<4x16x8x1xf32, #tpu.memory_space<vmem>>, %arg3: memref<2x16x8x1xf32, #tpu.memory_space<vmem>>, %arg4: memref<16x128xf32, #tpu.memory_space<vmem>>) attributes {dimension_semantics = [#tpu.dimension_semantics<parallel>], iteration_bounds = array<i64: 1>, scalar_prefetch = 0 : i64, scratch_operands = 0 : i64, tpu.core_type = #tpu.core_type<tc>, window_params = [{transform_indices = @transform_0, window_bounds = array<i64: 8, 128>}, {pipeline_mode = #tpu.pipeline_mode<synchronous>, transform_indices = @transform_1, window_bounds = array<i64: 4, 16, 8, 1>}, {pipeline_mode = #tpu.pipeline_mode<synchronous>, transform_indices = @transform_2, window_bounds = array<i64: 2, 16, 8, 1>}, {transform_indices = @transform_3, window_bounds = array<i64: 16, 128>}]} {
    %c0 = arith.constant 0 : index
    %c0_0 = arith.constant 0 : index
    %0 = vector.load %arg1[%c0, %c0_0] : memref<8x128xf32, #tpu.memory_space<vmem>>, vector<8x128xf32>
    %1 = math.tanh %0 : vector<8x128xf32>
    %2 = vector.shape_cast %1 : vector<8x128xf32> to vector<1x8x128xf32>
    %3 = vector.shape_cast %2 : vector<1x8x128xf32> to vector<1x8x128xf32>
    %4 = vector.broadcast %3 : vector<1x8x128xf32> to vector<16x8x128xf32>
    %c3 = arith.constant 3 : index
    %c0_1 = arith.constant 0 : index
    %c0_2 = arith.constant 0 : index
    %c0_3 = arith.constant 0 : index
    %5 = vector.load %arg2[%c3, %c0_1, %c0_2, %c0_3] : memref<4x16x8x1xf32, #tpu.memory_space<vmem>>, vector<1x16x8x1xf32>
    %6 = vector.shape_cast %5 : vector<1x16x8x1xf32> to vector<16x8x1xf32>
    %7 = vector.shape_cast %6 : vector<16x8x1xf32> to vector<16x8x1xf32>
    %8 = vector.broadcast %7 : vector<16x8x1xf32> to vector<16x8x128xf32>
    %9 = arith.mulf %8, %4 : vector<16x8x128xf32>
    %c2 = arith.constant 2 : index
    %c0_4 = arith.constant 0 : index
    %c0_5 = arith.constant 0 : index
    %c0_6 = arith.constant 0 : index
    %10 = vector.load %arg2[%c2, %c0_4, %c0_5, %c0_6] : memref<4x16x8x1xf32, #tpu.memory_space<vmem>>, vector<1x16x8x1xf32>
    %11 = vector.shape_cast %10 : vector<1x16x8x1xf32> to vector<16x8x1xf32>
    %12 = vector.broadcast %11 : vector<16x8x1xf32> to vector<16x8x128xf32>
    %13 = arith.addf %9, %12 : vector<16x8x128xf32>
    %14 = arith.mulf %13, %4 : vector<16x8x128xf32>
    %c1 = arith.constant 1 : index
    %c0_7 = arith.constant 0 : index
    %c0_8 = arith.constant 0 : index
    %c0_9 = arith.constant 0 : index
    %15 = vector.load %arg2[%c1, %c0_7, %c0_8, %c0_9] : memref<4x16x8x1xf32, #tpu.memory_space<vmem>>, vector<1x16x8x1xf32>
    %16 = vector.shape_cast %15 : vector<1x16x8x1xf32> to vector<16x8x1xf32>
    %17 = vector.broadcast %16 : vector<16x8x1xf32> to vector<16x8x128xf32>
    %18 = arith.addf %14, %17 : vector<16x8x128xf32>
    %19 = arith.mulf %18, %4 : vector<16x8x128xf32>
    %c0_10 = arith.constant 0 : index
    %c0_11 = arith.constant 0 : index
    %c0_12 = arith.constant 0 : index
    %c0_13 = arith.constant 0 : index
    %20 = vector.load %arg2[%c0_10, %c0_11, %c0_12, %c0_13] : memref<4x16x8x1xf32, #tpu.memory_space<vmem>>, vector<1x16x8x1xf32>
    %21 = vector.shape_cast %20 : vector<1x16x8x1xf32> to vector<16x8x1xf32>
    %22 = vector.broadcast %21 : vector<16x8x1xf32> to vector<16x8x128xf32>
    %23 = arith.addf %19, %22 : vector<16x8x128xf32>
    %c1_14 = arith.constant 1 : index
    %c0_15 = arith.constant 0 : index
    %c0_16 = arith.constant 0 : index
    %c0_17 = arith.constant 0 : index
    %24 = vector.load %arg3[%c1_14, %c0_15, %c0_16, %c0_17] : memref<2x16x8x1xf32, #tpu.memory_space<vmem>>, vector<1x16x8x1xf32>
    %25 = vector.shape_cast %24 : vector<1x16x8x1xf32> to vector<16x8x1xf32>
    %26 = vector.shape_cast %25 : vector<16x8x1xf32> to vector<16x8x1xf32>
    %27 = vector.broadcast %26 : vector<16x8x1xf32> to vector<16x8x128xf32>
    %28 = arith.mulf %27, %4 : vector<16x8x128xf32>
    %c0_18 = arith.constant 0 : index
    %c0_19 = arith.constant 0 : index
    %c0_20 = arith.constant 0 : index
    %c0_21 = arith.constant 0 : index
    %29 = vector.load %arg3[%c0_18, %c0_19, %c0_20, %c0_21] : memref<2x16x8x1xf32, #tpu.memory_space<vmem>>, vector<1x16x8x1xf32>
    %30 = vector.shape_cast %29 : vector<1x16x8x1xf32> to vector<16x8x1xf32>
    %31 = vector.broadcast %30 : vector<16x8x1xf32> to vector<16x8x128xf32>
    %32 = arith.addf %28, %31 : vector<16x8x128xf32>
    %33 = arith.mulf %32, %4 : vector<16x8x128xf32>
    %34 = math.absf %33 : vector<16x8x128xf32>
    %cst = arith.constant 1.000000e+00 : f32
    %35 = vector.broadcast %cst : f32 to vector<16x8x128xf32>
    %36 = arith.addf %34, %35 : vector<16x8x128xf32>
    %37 = tpu.reciprocal %36 : vector<16x8x128xf32> -> vector<16x8x128xf32>
    %38 = arith.mulf %23, %37 : vector<16x8x128xf32>
    %cst_22 = arith.constant dense<0.000000e+00> : vector<16x128xf32>
    %39 = vector.multi_reduction <add>, %38, %cst_22 [1] : vector<16x8x128xf32> to vector<16x128xf32>
    %c0_23 = arith.constant 0 : index
    %c0_24 = arith.constant 0 : index
    %40 = vector.load %arg4[%c0_23, %c0_24] : memref<16x128xf32, #tpu.memory_space<vmem>>, vector<16x128xf32>
    tpu.vector_store %arg4[%c0_23, %c0_24], %39 {strides = array<i32>} : memref<16x128xf32, #tpu.memory_space<vmem>>, vector<16x128xf32>,
    return
  }
  func.func @transform_0(%arg0: i32) -> (i32, i32) {
    %c0_i32 = arith.constant 0 : i32
    %c0_i32_0 = arith.constant 0 : i32
    return %c0_i32, %arg0 : i32, i32
  }
  func.func @transform_1(%arg0: i32) -> (i32, i32, i32, i32) {
    %c0_i32 = arith.constant 0 : i32
    %c0_i32_0 = arith.constant 0 : i32
    %c0_i32_1 = arith.constant 0 : i32
    %c0_i32_2 = arith.constant 0 : i32
    %c0_i32_3 = arith.constant 0 : i32
    return %c0_i32, %c0_i32_0, %c0_i32_1, %c0_i32_2 : i32, i32, i32, i32
  }
  func.func @transform_2(%arg0: i32) -> (i32, i32, i32, i32) {
    %c0_i32 = arith.constant 0 : i32
    %c0_i32_0 = arith.constant 0 : i32
    %c0_i32_1 = arith.constant 0 : i32
    %c0_i32_2 = arith.constant 0 : i32
    %c0_i32_3 = arith.constant 0 : i32
    return %c0_i32, %c0_i32_0, %c0_i32_1, %c0_i32_2 : i32, i32, i32, i32
  }
  func.func @transform_3(%arg0: i32) -> (i32, i32) {
    %c0_i32 = arith.constant 0 : i32
    %c0_i32_0 = arith.constant 0 : i32
    return %c0_i32, %arg0 : i32, i32
  }
}

</mosaic_0001>

<bundles_post_ra>
// kernel: custom_rational_layer_forward.1
= control target key start
LH: loop header
LB: loop body
LE: loop exit
PB: predicated region body
PF: predicated region fallthrough
CT: control target
= control target key end

     0   :  { %v1046_v0 = vmov 0   ;;  %vm916_vm0 = vcmask 1041409   ;;  %vm918_vm1 = vcmask 1042434   ;;  %vm920_vm2 = vcmask 1043459   ;;  %s1569_s1 = inlined_call_operand.vmem [shape: f32[4,16,8,1], index: 1, kind: input, shape index: {}]   ;;  %s1570_s2 = inlined_call_operand.vmem [shape: f32[2,16,8,1], index: 2, kind: input, shape index: {}]   ;;  %s1571_s0 = inlined_call_operand.vmem [shape: f32[8,128], index: 0, kind: input, shape index: {}]   ;;  %s1572_s3 = inlined_call_operand.vmem [shape: f32[16,128], index: 3, kind: output, shape index: {}]  }
   0x1   :  { %1011 = vset.pattern.permute.xlu1 %v1046_v0  ;;  %1010 = vset.pattern.permute.xlu0 %v1046_v0  ;;  %v947_v1 = vld [vmem:[%s1569_s1 + $0x190] sm:$0xff]  ;;  %v945_v2 = vld [vmem:[%s1569_s1 + $0x180] sm:$0xff]  ;;  %v948_v3 = vld [vmem:[%s1569_s1 + $0x198] sm:$0xff]  ;;  %vm922_vm3 = vcmask 1044484   ;;  %vm924_vm4 = vcmask 1045509   ;;  %vm926_vm5 = vcmask 1046534  }
   0x2   :  { %45 = vperm.xlu1 %1011, %v947_v1   ;;  %35 = vperm.xlu0 %1010, %v945_v2   ;;  %v946_v4 = vld [vmem:[%s1569_s1 + $0x188] sm:$0xff]  ;;  %v949_v6 = vld [vmem:[%s1569_s1 + $0x1a0] sm:$0xff]  ;;  %v952_v7 = vld [vmem:[%s1569_s1 + $0x1b8] sm:$0xff]  ;;  %vm928_vm6 = vcmask 1047559  }
   0x3   :  { %v950_v5 = vld [vmem:[%s1569_s1 + $0x1a8] sm:$0xff]  ;;  %v951_v8 = vld [vmem:[%s1569_s1 + $0x1b0] sm:$0xff]  ;;  %v953_v10 = vld [vmem:[%s1569_s1 + $0x1c0] sm:$0xff] }
   0x4   :  { %v954_v9 = vld [vmem:[%s1569_s1 + $0x1c8] sm:$0xff]  ;;  %v956_v11 = vld [vmem:[%s1569_s1 + $0x1d8] sm:$0xff]  ;;  %v955_v12 = vld [vmem:[%s1569_s1 + $0x1d0] sm:$0xff] }
   0x5   :  { %v958_v13 = vld [vmem:[%s1569_s1 + $0x1e8] sm:$0xff]  ;;  %v957_v14 = vld [vmem:[%s1569_s1 + $0x1e0] sm:$0xff]  ;;  %v960_v15 = vld [vmem:[%s1569_s1 + $0x1f8] sm:$0xff] }
   0x6   :  { %50 = vperm.xlu1 %1011, %v948_v3   ;;  %40 = vperm.xlu0 %1010, %v946_v4   ;;  %v959_v16 = vld [vmem:[%s1569_s1 + $0x1f0] sm:$0xff]  ;;  %v962_v17 = vld [vmem:[%s1569_s1 + $0x108] sm:$0xff]  ;;  %v961_v18 = vld [vmem:[%s1569_s1 + $0x100] sm:$0xff] }
   0x7   :  { %v964_v19 = vld [vmem:[%s1569_s1 + $0x118] sm:$0xff]  ;;  %v963_v20 = vld [vmem:[%s1569_s1 + $0x110] sm:$0xff]  ;;  %v966_v21 = vld [vmem:[%s1569_s1 + $0x128] sm:$0xff] }
   0x8   :  { %v965_v22 = vld [vmem:[%s1569_s1 + $0x120] sm:$0xff]  ;;  %v968_v23 = vld [vmem:[%s1569_s1 + $0x138] sm:$0xff]  ;;  %v967_v24 = vld [vmem:[%s1569_s1 + $0x130] sm:$0xff] }
   0x9   :  { %v970_v25 = vld [vmem:[%s1569_s1 + $0x148] sm:$0xff]  ;;  %v969_v26 = vld [vmem:[%s1569_s1 + $0x140] sm:$0xff]  ;;  %v972_v27 = vld [vmem:[%s1569_s1 + $0x158] sm:$0xff] }
   0xa   :  { %60 = vperm.xlu1 %1011, %v950_v5   ;;  %55 = vperm.xlu0 %1010, %v949_v6   ;;  %v971_v28 = vld [vmem:[%s1569_s1 + $0x150] sm:$0xff]  ;;  %v974_v29 = vld [vmem:[%s1569_s1 + $0x168] sm:$0xff]  ;;  %v973_v30 = vld [vmem:[%s1569_s1 + $0x160] sm:$0xff] }
   0xb   :  { %v976_v31 = vld [vmem:[%s1569_s1 + $0x178] sm:$0xff]  ;;  %v975_v32 = vld [vmem:[%s1569_s1 + $0x170] sm:$0xff]  ;;  %v978_v33 = vld [vmem:[%s1569_s1 + $0x88] sm:$0xff] }
   0xc   :  { %v977_v34 = vld [vmem:[%s1569_s1 + $0x80] sm:$0xff]  ;;  %v980_v35 = vld [vmem:[%s1569_s1 + $0x98] sm:$0xff]  ;;  %v979_v36 = vld [vmem:[%s1569_s1 + $0x90] sm:$0xff] }
   0xd   :  { %v982_v37 = vld [vmem:[%s1569_s1 + $0xa8] sm:$0xff]  ;;  %v981_v38 = vld [vmem:[%s1569_s1 + $0xa0] sm:$0xff]  ;;  %v984_v39 = vld [vmem:[%s1569_s1 + $0xb8] sm:$0xff] }
   0xe   :  { %70 = vperm.xlu1 %1011, %v952_v7   ;;  %65 = vperm.xlu0 %1010, %v951_v8   ;;  %v983_v40 = vld [vmem:[%s1569_s1 + $0xb0] sm:$0xff]  ;;  %v986_v41 = vld [vmem:[%s1569_s1 + $0xc8] sm:$0xff]  ;;  %v985_v42 = vld [vmem:[%s1569_s1 + $0xc0] sm:$0xff] }
   0xf   :  { %v988_v43 = vld [vmem:[%s1569_s1 + $0xd8] sm:$0xff]  ;;  %v987_v44 = vld [vmem:[%s1569_s1 + $0xd0] sm:$0xff]  ;;  %v990_v45 = vld [vmem:[%s1569_s1 + $0xe8] sm:$0xff] }
  0x10   :  { %v989_v46 = vld [vmem:[%s1569_s1 + $0xe0] sm:$0xff]  ;;  %v992_v47 = vld [vmem:[%s1569_s1 + $0xf8] sm:$0xff]  ;;  %v991_v48 = vld [vmem:[%s1569_s1 + $0xf0] sm:$0xff] }
  0x11   :  { %v388_v49 = vld [vmem:[%s1569_s1 + $0x8] sm:$0xff]  ;;  %v387_v50 = vld [vmem:[%s1569_s1] sm:$0xff]  ;;  %v390_v51 = vld [vmem:[%s1569_s1 + $0x18] sm:$0xff] }
  0x12   :  { %80 = vperm.xlu1 %1011, %v954_v9   ;;  %75 = vperm.xlu0 %1010, %v953_v10   ;;  %v389_v52 = vld [vmem:[%s1569_s1 + $0x10] sm:$0xff]  ;;  %v392_v53 = vld [vmem:[%s1569_s1 + $0x28] sm:$0xff]  ;;  %v391_v54 = vld [vmem:[%s1569_s1 + $0x20] sm:$0xff] }
  0x13   :  { %v394_v55 = vld [vmem:[%s1569_s1 + $0x38] sm:$0xff]  ;;  %v393_v56 = vld [vmem:[%s1569_s1 + $0x30] sm:$0xff]  ;;  %v396_v57 = vld [vmem:[%s1569_s1 + $0x48] sm:$0xff] }
  0x14   :  { %v395_v58 = vld [vmem:[%s1569_s1 + $0x40] sm:$0xff]  ;;  %v398_v59 = vld [vmem:[%s1569_s1 + $0x58] sm:$0xff]  ;;  %v397_v60 = vld [vmem:[%s1569_s1 + $0x50] sm:$0xff] }
  0x15   :  { %v400_v61 = vld [vmem:[%s1569_s1 + $0x68] sm:$0xff]  ;;  %v399_v62 = vld [vmem:[%s1569_s1 + $0x60] sm:$0xff]  ;;  %v402_v63 = vld [vmem:[%s1569_s1 + $0x78] sm:$0xff] }
  0x16   :  { %90 = vperm.xlu1 %1011, %v956_v11   ;;  %85 = vperm.xlu0 %1010, %v955_v12   ;;  %v401_v0 = vld [vmem:[%s1569_s1 + $0x70] sm:$0xff]  ;;  %v994_v1 = vld [vmem:[%s1570_s2 + $0x88] sm:$0xff]  ;;  %v993_v2 = vld [vmem:[%s1570_s2 + $0x80] sm:$0xff] }
  0x17   :  { %v996_v5 = vld [vmem:[%s1570_s2 + $0x98] sm:$0xff]  ;;  %v995_v6 = vld [vmem:[%s1570_s2 + $0x90] sm:$0xff]  ;;  %v998_v9 = vld [vmem:[%s1570_s2 + $0xa8] sm:$0xff] }
  0x18   :  { %v997_v10 = vld [vmem:[%s1570_s2 + $0xa0] sm:$0xff] }
  0x1a   :  { %100 = vperm.xlu1 %1011, %v958_v13   ;;  %95 = vperm.xlu0 %1010, %v957_v14   ;;  %v1002_v13 = vld [vmem:[%s1570_s2 + $0xc8] sm:$0xff]  ;;  %v1001_v14 = vld [vmem:[%s1570_s2 + $0xc0] sm:$0xff] }
  0x1e   :  { %110 = vperm.xlu1 %1011, %v960_v15   ;;  %105 = vperm.xlu0 %1010, %v959_v16  }
  0x22   :  { %153 = vperm.xlu1 %1011, %v962_v17   ;;  %148 = vperm.xlu0 %1010, %v961_v18   ;;  %v1004_v17 = vld [vmem:[%s1570_s2 + $0xd8] sm:$0xff]  ;;  %v1003_v18 = vld [vmem:[%s1570_s2 + $0xd0] sm:$0xff] }
  0x26   :  { %163 = vperm.xlu1 %1011, %v964_v19   ;;  %158 = vperm.xlu0 %1010, %v963_v20   ;;  %v14_v19 = vld [vmem:[%s1571_s0] sm:$0xff] }
  0x27   :  { %1012 = vtanh.f32 %v14_v19  ;;  %v626_v19 = vld [vmem:[%s1570_s2 + $0x70] sm:$0xff] }
  0x2a   :  { %173 = vperm.xlu1 %1011, %v966_v21   ;;  %168 = vperm.xlu0 %1010, %v965_v22   ;;  %v613_v22 = vld [vmem:[%s1570_s2 + $0x8] sm:$0xff] }
  0x2e   :  { %183 = vperm.xlu1 %1011, %v968_v23   ;;  %178 = vperm.xlu0 %1010, %v967_v24   ;;  %v612_v23 = vld [vmem:[%s1570_s2] sm:$0xff] }
  0x32   :  { %193 = vperm.xlu1 %1011, %v970_v25   ;;  %188 = vperm.xlu0 %1010, %v969_v26   ;;  %v621_v26 = vld [vmem:[%s1570_s2 + $0x48] sm:$0xff] }
  0x36   :  { %203 = vperm.xlu1 %1011, %v972_v27   ;;  %198 = vperm.xlu0 %1010, %v971_v28   ;;  %v620_v27 = vld [vmem:[%s1570_s2 + $0x40] sm:$0xff] }
  0x3a   :  { %213 = vperm.xlu1 %1011, %v974_v29   ;;  %208 = vperm.xlu0 %1010, %v973_v30   ;;  %v614_v30 = vld [vmem:[%s1570_s2 + $0x10] sm:$0xff] }
  0x3e   :  { %223 = vperm.xlu1 %1011, %v976_v31   ;;  %218 = vperm.xlu0 %1010, %v975_v32   ;;  %v1005_v31 = vld [vmem:[%s1570_s2 + $0xe0] sm:$0xff]  ;;  %v1326_v32 = vpop.eup %1012 }
  0x42   :  { %282 = vperm.xlu1 %1011, %v978_v33   ;;  %277 = vperm.xlu0 %1010, %v977_v34  }
  0x46   :  { %292 = vperm.xlu1 %1011, %v980_v35   ;;  %287 = vperm.xlu0 %1010, %v979_v36   ;;  %v1006_v35 = vld [vmem:[%s1570_s2 + $0xe8] sm:$0xff]  ;;  %v622_v36 = vld [vmem:[%s1570_s2 + $0x50] sm:$0xff] }
  0x4a   :  { %302 = vperm.xlu1 %1011, %v982_v37   ;;  %297 = vperm.xlu0 %1010, %v981_v38  }
  0x4e   :  { %312 = vperm.xlu1 %1011, %v984_v39   ;;  %307 = vperm.xlu0 %1010, %v983_v40  }
  0x52   :  { %322 = vperm.xlu1 %1011, %v986_v41   ;;  %317 = vperm.xlu0 %1010, %v985_v42  }
  0x56   :  { %332 = vperm.xlu1 %1011, %v988_v43   ;;  %327 = vperm.xlu0 %1010, %v987_v44   ;;  %v623_v43 = vld [vmem:[%s1570_s2 + $0x58] sm:$0xff] }
  0x57   :  { %v615_v44 = vld [vmem:[%s1570_s2 + $0x18] sm:$0xff] }
  0x5a   :  { %342 = vperm.xlu1 %1011, %v990_v45   ;;  %337 = vperm.xlu0 %1010, %v989_v46  }
  0x5e   :  { %352 = vperm.xlu1 %1011, %v992_v47   ;;  %347 = vperm.xlu0 %1010, %v991_v48  }
  0x62   :  { %410 = vperm.xlu1 %1011, %v388_v49   ;;  %405 = vperm.xlu0 %1010, %v387_v50  }
  0x66   :  { %420 = vperm.xlu1 %1011, %v390_v51   ;;  %415 = vperm.xlu0 %1010, %v389_v52   ;;  %v1007_v51 = vld [vmem:[%s1570_s2 + $0xf0] sm:$0xff] }
  0x67   :  { %v999_v52 = vld [vmem:[%s1570_s2 + $0xb0] sm:$0xff] }
  0x6a   :  { %430 = vperm.xlu1 %1011, %v392_v53   ;;  %425 = vperm.xlu0 %1010, %v391_v54  }
  0x6e   :  { %440 = vperm.xlu1 %1011, %v394_v55   ;;  %435 = vperm.xlu0 %1010, %v393_v56  }
  0x72   :  { %450 = vperm.xlu1 %1011, %v396_v57   ;;  %445 = vperm.xlu0 %1010, %v395_v58  }
  0x76   :  { %460 = vperm.xlu1 %1011, %v398_v59   ;;  %455 = vperm.xlu0 %1010, %v397_v60   ;;  %v624_v59 = vld [vmem:[%s1570_s2 + $0x60] sm:$0xff] }
  0x77   :  { %v616_v60 = vld [vmem:[%s1570_s2 + $0x20] sm:$0xff] }
  0x7a   :  { %470 = vperm.xlu1 %1011, %v400_v61   ;;  %465 = vperm.xlu0 %1010, %v399_v62  }
  0x7e   :  { %480 = vperm.xlu1 %1011, %v402_v63   ;;  %475 = vperm.xlu0 %1010, %v401_v0  }
  0x81   :  { %v46_v3 = vpop.permute.xlu1 %45  ;;  %v36_v4 = vpop.permute.xlu0 %35 }
  0x82   :  { %523 = vperm.xlu1 %1011, %v994_v1   ;;  %518 = vperm.xlu0 %1010, %v993_v2   ;;  %v113_v37 = vmul.f32 %v1326_v32, %v36_v4  ;;  %v115_v45 = vmul.f32 %v1326_v32, %v46_v3  ;;  %v1008_v3 = vld [vmem:[%s1570_s2 + $0xf8] sm:$0xff] }
  0x83   :  { %v1000_v4 = vld [vmem:[%s1570_s2 + $0xb8] sm:$0xff] }
  0x85   :  { %v51_v7 = vpop.permute.xlu1 %50  ;;  %v41_v8 = vpop.permute.xlu0 %40 }
  0x86   :  { %533 = vperm.xlu1 %1011, %v996_v5   ;;  %528 = vperm.xlu0 %1010, %v995_v6   ;;  %v114_v38 = vmul.f32 %v1326_v32, %v41_v8  ;;  %v116_v46 = vmul.f32 %v1326_v32, %v51_v7 }
  0x89   :  { %v61_v11 = vpop.permute.xlu1 %60  ;;  %v56_v12 = vpop.permute.xlu0 %55 }
  0x8a   :  { %543 = vperm.xlu1 %1011, %v998_v9   ;;  %538 = vperm.xlu0 %1010, %v997_v10   ;;  %v118_v53 = vmul.f32 %v1326_v32, %v61_v11  ;;  %v117_v54 = vmul.f32 %v1326_v32, %v56_v12  ;;  %v625_v11 = vld [vmem:[%s1570_s2 + $0x68] sm:$0xff] }
  0x8b   :  { %v617_v12 = vld [vmem:[%s1570_s2 + $0x28] sm:$0xff] }
  0x8d   :  { %v1283_v15 = vpop.permute.xlu1 %70  ;;  %v1285_v16 = vpop.permute.xlu0 %65 }
  0x8e   :  { %563 = vperm.xlu1 %1011, %v1002_v13   ;;  %558 = vperm.xlu0 %1010, %v1001_v14   ;;  %v120_v61 = vmul.f32 %v1326_v32, %v1283_v15  ;;  %v119_v62 = vmul.f32 %v1326_v32, %v1285_v16 }
  0x91   :  { %v1296_v20 = vpop.permute.xlu1 %80  ;;  %v1298_v21 = vpop.permute.xlu0 %75 }
  0x92   :  { %573 = vperm.xlu1 %1011, %v1004_v17   ;;  %568 = vperm.xlu0 %1010, %v1003_v18   ;;  %v122_v5 = vmul.f32 %v1326_v32, %v1296_v20  ;;  %v121_v6 = vmul.f32 %v1326_v32, %v1298_v21  ;;  %v618_v20 = vld [vmem:[%s1570_s2 + $0x30] sm:$0xff] }
  0x95   :  { %v1306_v24 = vpop.permute.xlu1 %90  ;;  %v1308_v25 = vpop.permute.xlu0 %85 }
  0x96   :  { %635 = vperm.xlu1 %1011, %v613_v22   ;;  %630 = vperm.xlu0 %1010, %v612_v23   ;;  %v124_v13 = vmul.f32 %v1326_v32, %v1306_v24  ;;  %v123_v14 = vmul.f32 %v1326_v32, %v1308_v25 }
  0x99   :  { %v1316_v28 = vpop.permute.xlu1 %100  ;;  %v1318_v29 = vpop.permute.xlu0 %95 }
  0x9a   :  { %675 = vperm.xlu1 %1011, %v621_v26   ;;  %670 = vperm.xlu0 %1010, %v620_v27   ;;  %v126_v21 = vmul.f32 %v1326_v32, %v1316_v28  ;;  %v125_v22 = vmul.f32 %v1326_v32, %v1318_v29  ;;  %v627_v27 = vld [vmem:[%s1570_s2 + $0x78] sm:$0xff] }
  0x9d   :  { %v1328_v33 = vpop.permute.xlu1 %110  ;;  %v1330_v34 = vpop.permute.xlu0 %105 }
  0x9e   :  { %640 = vperm.xlu1 %1011, %v614_v30   ;;  %578 = vperm.xlu0 %1010, %v1005_v31   ;;  %v619_v30 = vld [vmem:[%s1570_s2 + $0x38] sm:$0xff]  ;;  %v128_v28 = vmul.f32 %v1326_v32, %v1328_v33  ;;  %v127_v29 = vmul.f32 %v1326_v32, %v1330_v34 }
  0xa1   :  { %v154_v39 = vpop.permute.xlu1 %153  ;;  %v149_v40 = vpop.permute.xlu0 %148 }
  0xa2   :  { %v1340_v41 = vadd.f32 %v154_v39, %v114_v38  ;;  %v1342_v42 = vadd.f32 %v149_v40, %v113_v37  ;;  %583 = vperm.xlu1 %1011, %v1006_v35   ;;  %680 = vperm.xlu0 %1010, %v622_v36  }
  0xa4   :  { %v243_v38 = vmul.f32 %v1326_v32, %v1340_v41  ;;  %v242_v39 = vmul.f32 %v1326_v32, %v1342_v42 }
  0xa5   :  { %v164_v47 = vpop.permute.xlu1 %163  ;;  %v159_v48 = vpop.permute.xlu0 %158 }
  0xa6   :  { %v1352_v49 = vadd.f32 %v164_v47, %v116_v46  ;;  %v1354_v50 = vadd.f32 %v159_v48, %v115_v45  ;;  %685 = vperm.xlu1 %1011, %v623_v43   ;;  %645 = vperm.xlu0 %1010, %v615_v44  }
  0xa8   :  { %v245_v33 = vmul.f32 %v1326_v32, %v1352_v49  ;;  %v244_v34 = vmul.f32 %v1326_v32, %v1354_v50 }
  0xa9   :  { %v174_v55 = vpop.permute.xlu1 %173  ;;  %v169_v56 = vpop.permute.xlu0 %168 }
  0xaa   :  { %v1364_v57 = vadd.f32 %v174_v55, %v118_v53  ;;  %v1366_v58 = vadd.f32 %v169_v56, %v117_v54  ;;  %588 = vperm.xlu1 %1011, %v1007_v51   ;;  %548 = vperm.xlu0 %1010, %v999_v52  }
  0xac   :  { %v247_v41 = vmul.f32 %v1326_v32, %v1364_v57  ;;  %v246_v42 = vmul.f32 %v1326_v32, %v1366_v58 }
  0xad   :  { %v184_v63 = vpop.permute.xlu1 %183  ;;  %v179_v0 = vpop.permute.xlu0 %178 }
  0xae   :  { %v233_v1 = vadd.f32 %v184_v63, %v120_v61  ;;  %v232_v2 = vadd.f32 %v179_v0, %v119_v62  ;;  %690 = vperm.xlu1 %1011, %v624_v59   ;;  %650 = vperm.xlu0 %1010, %v616_v60  }
  0xb0   :  { %v249_v56 = vmul.f32 %v1326_v32, %v233_v1  ;;  %v248_v49 = vmul.f32 %v1326_v32, %v232_v2 }
  0xb1   :  { %v194_v7 = vpop.permute.xlu1 %193  ;;  %v189_v8 = vpop.permute.xlu0 %188 }
  0xb2   :  { %v235_v9 = vadd.f32 %v194_v7, %v122_v5  ;;  %v234_v10 = vadd.f32 %v189_v8, %v121_v6  ;;  %593 = vperm.xlu1 %1011, %v1008_v3   ;;  %553 = vperm.xlu0 %1010, %v1000_v4  }
  0xb4   :  { %v251_v62 = vmul.f32 %v1326_v32, %v235_v9  ;;  %v250_v63 = vmul.f32 %v1326_v32, %v234_v10 }
  0xb5   :  { %v204_v15 = vpop.permute.xlu1 %203  ;;  %v199_v16 = vpop.permute.xlu0 %198 }
  0xb6   :  { %v237_v17 = vadd.f32 %v204_v15, %v124_v13  ;;  %v236_v18 = vadd.f32 %v199_v16, %v123_v14  ;;  %695 = vperm.xlu1 %1011, %v625_v11   ;;  %655 = vperm.xlu0 %1010, %v617_v12  }
  0xb8   :  { %v253_v4 = vmul.f32 %v1326_v32, %v237_v17  ;;  %v252_v5 = vmul.f32 %v1326_v32, %v236_v18 }
  0xb9   :  { %v214_v23 = vpop.permute.xlu1 %213  ;;  %v209_v24 = vpop.permute.xlu0 %208 }
  0xba   :  { %v239_v25 = vadd.f32 %v214_v23, %v126_v21  ;;  %v238_v26 = vadd.f32 %v209_v24, %v125_v22  ;;  %700 = vperm.xlu1 %1011, %v626_v19   ;;  %660 = vperm.xlu0 %1010, %v618_v20  }
  0xbc   :  { %v255_v8 = vmul.f32 %v1326_v32, %v239_v25  ;;  %v254_v11 = vmul.f32 %v1326_v32, %v238_v26 }
  0xbd   :  { %v224_v31 = vpop.permute.xlu1 %223  ;;  %v219_v35 = vpop.permute.xlu0 %218 }
  0xbe   :  { %v241_v36 = vadd.f32 %v224_v31, %v128_v28  ;;  %v240_v37 = vadd.f32 %v219_v35, %v127_v29  ;;  %705 = vperm.xlu1 %1011, %v627_v27   ;;  %665 = vperm.xlu0 %1010, %v619_v30  }
  0xc0   :  { %v257_v14 = vmul.f32 %v1326_v32, %v241_v36  ;;  %v256_v15 = vmul.f32 %v1326_v32, %v240_v37 }
  0xc1   :  { %v283_v40 = vpop.permute.xlu1 %282  ;;  %v278_v43 = vpop.permute.xlu0 %277 }
  0xc2   :  { %v356_v44 = vadd.f32 %v283_v40, %v243_v38  ;;  %v355_v45 = vadd.f32 %v278_v43, %v242_v39 }
  0xc4   :  { %v372_v20 = vmul.f32 %v1326_v32, %v356_v44  ;;  %v371_v21 = vmul.f32 %v1326_v32, %v355_v45 }
  0xc5   :  { %v293_v46 = vpop.permute.xlu1 %292  ;;  %v288_v47 = vpop.permute.xlu0 %287 }
  0xc6   :  { %v358_v48 = vadd.f32 %v293_v46, %v245_v33  ;;  %v357_v51 = vadd.f32 %v288_v47, %v244_v34 }
  0xc8   :  { %v374_v26 = vmul.f32 %v1326_v32, %v358_v48  ;;  %v373_v27 = vmul.f32 %v1326_v32, %v357_v51 }
  0xc9   :  { %v303_v52 = vpop.permute.xlu1 %302  ;;  %v298_v53 = vpop.permute.xlu0 %297 }
  0xca   :  { %v360_v54 = vadd.f32 %v303_v52, %v247_v41  ;;  %v359_v55 = vadd.f32 %v298_v53, %v246_v42 }
  0xcc   :  { %v376_v35 = vmul.f32 %v1326_v32, %v360_v54  ;;  %v375_v36 = vmul.f32 %v1326_v32, %v359_v55 }
  0xcd   :  { %v313_v59 = vpop.permute.xlu1 %312  ;;  %v308_v50 = vpop.permute.xlu0 %307 }
  0xce   :  { %v362_v60 = vadd.f32 %v313_v59, %v249_v56  ;;  %v361_v61 = vadd.f32 %v308_v50, %v248_v49 }
  0xd0   :  { %v378_v43 = vmul.f32 %v1326_v32, %v362_v60  ;;  %v377_v44 = vmul.f32 %v1326_v32, %v361_v61 }
  0xd1   :  { %v323_v57 = vpop.permute.xlu1 %322  ;;  %v318_v0 = vpop.permute.xlu0 %317 }
  0xd2   :  { %v364_v3 = vadd.f32 %v323_v57, %v251_v62  ;;  %v363_v58 = vadd.f32 %v318_v0, %v250_v63 }
  0xd4   :  { %v380_v47 = vmul.f32 %v1326_v32, %v364_v3  ;;  %v379_v48 = vmul.f32 %v1326_v32, %v363_v58 }
  0xd5   :  { %v333_v6 = vpop.permute.xlu1 %332  ;;  %v328_v1 = vpop.permute.xlu0 %327 }
  0xd6   :  { %v366_v7 = vadd.f32 %v333_v6, %v253_v4  ;;  %v365_v2 = vadd.f32 %v328_v1, %v252_v5 }
  0xd8   :  { %v382_v53 = vmul.f32 %v1326_v32, %v366_v7  ;;  %v381_v54 = vmul.f32 %v1326_v32, %v365_v2 }
  0xd9   :  { %v343_v12 = vpop.permute.xlu1 %342  ;;  %v338_v9 = vpop.permute.xlu0 %337 }
  0xda   :  { %v368_v13 = vadd.f32 %v343_v12, %v255_v8  ;;  %v367_v10 = vadd.f32 %v338_v9, %v254_v11 }
  0xdc   :  { %v384_v50 = vmul.f32 %v1326_v32, %v368_v13  ;;  %v383_v60 = vmul.f32 %v1326_v32, %v367_v10 }
  0xdd   :  { %v353_v16 = vpop.permute.xlu1 %352  ;;  %v348_v17 = vpop.permute.xlu0 %347 }
  0xde   :  { %v370_v19 = vadd.f32 %v353_v16, %v257_v14  ;;  %v369_v18 = vadd.f32 %v348_v17, %v256_v15 }
  0xe0   :  { %v386_v0 = vmul.f32 %v1326_v32, %v370_v19  ;;  %v385_v3 = vmul.f32 %v1326_v32, %v369_v18 }
  0xe1   :  { %v411_v22 = vpop.permute.xlu1 %410  ;;  %v406_v23 = vpop.permute.xlu0 %405 }
  0xe2   :  { %v1442_v24 = vadd.f32 %v411_v22, %v372_v20  ;;  %v1444_v25 = vadd.f32 %v406_v23, %v371_v21 }
  0xe5   :  { %v421_v30 = vpop.permute.xlu1 %420  ;;  %v416_v28 = vpop.permute.xlu0 %415 }
  0xe6   :  { %v1448_v29 = vadd.f32 %v421_v30, %v374_v26  ;;  %v1450_v31 = vadd.f32 %v416_v28, %v373_v27 }
  0xe9   :  { %v431_v37 = vpop.permute.xlu1 %430  ;;  %v426_v38 = vpop.permute.xlu0 %425 }
  0xea   :  { %v1454_v39 = vadd.f32 %v431_v37, %v376_v35  ;;  %v1456_v40 = vadd.f32 %v426_v38, %v375_v36 }
  0xed   :  { %v441_v45 = vpop.permute.xlu1 %440  ;;  %v436_v33 = vpop.permute.xlu0 %435 }
  0xee   :  { %v1460_v34 = vadd.f32 %v441_v45, %v378_v43  ;;  %v1462_v46 = vadd.f32 %v436_v33, %v377_v44 }
  0xf1   :  { %v451_v51 = vpop.permute.xlu1 %450  ;;  %v446_v41 = vpop.permute.xlu0 %445 }
  0xf2   :  { %v1466_v42 = vadd.f32 %v451_v51, %v380_v47  ;;  %v1468_v52 = vadd.f32 %v446_v41, %v379_v48 }
  0xf5   :  { %v461_v55 = vpop.permute.xlu1 %460  ;;  %v456_v56 = vpop.permute.xlu0 %455 }
  0xf6   :  { %v1472_v49 = vadd.f32 %v461_v55, %v382_v53  ;;  %v1474_v59 = vadd.f32 %v456_v56, %v381_v54 }
  0xf9   :  { %v471_v61 = vpop.permute.xlu1 %470  ;;  %v466_v62 = vpop.permute.xlu0 %465 }
  0xfa   :  { %v1478_v63 = vadd.f32 %v471_v61, %v384_v50  ;;  %v1480_v57 = vadd.f32 %v466_v62, %v383_v60 }
  0xfd   :  { %v481_v58 = vpop.permute.xlu1 %480  ;;  %v476_v4 = vpop.permute.xlu0 %475 }
  0xfe   :  { %v1484_v5 = vadd.f32 %v481_v58, %v386_v0  ;;  %v1486_v6 = vadd.f32 %v476_v4, %v385_v3 }
 0x101   :  { %v524_v1 = vpop.permute.xlu1 %523  ;;  %v519_v7 = vpop.permute.xlu0 %518 }
 0x102   :  { %v597_v15 = vmul.f32 %v1326_v32, %v524_v1  ;;  %v596_v16 = vmul.f32 %v1326_v32, %v519_v7 }
 0x105   :  { %v534_v2 = vpop.permute.xlu1 %533  ;;  %v529_v8 = vpop.permute.xlu0 %528 }
 0x106   :  { %v598_v38 = vmul.f32 %v1326_v32, %v529_v8  ;;  %v599_v3 = vmul.f32 %v1326_v32, %v534_v2 }
 0x109   :  { %v1488_v11 = vpop.permute.xlu1 %543  ;;  %v1490_v12 = vpop.permute.xlu0 %538 }
 0x10d   :  { %v564_v9 = vpop.permute.xlu1 %563  ;;  %v559_v13 = vpop.permute.xlu0 %558 }
 0x10e   :  { %v605_v21 = vmul.f32 %v1326_v32, %v564_v9  ;;  %v604_v22 = vmul.f32 %v1326_v32, %v559_v13 }
 0x111   :  { %v574_v10 = vpop.permute.xlu1 %573  ;;  %v569_v14 = vpop.permute.xlu0 %568 }
 0x112   :  { %v606_v54 = vmul.f32 %v1326_v32, %v569_v14  ;;  %v607_v58 = vmul.f32 %v1326_v32, %v574_v10 }
 0x115   :  { %v636_v17 = vpop.permute.xlu1 %635  ;;  %v631_v19 = vpop.permute.xlu0 %630 }
 0x116   :  { %v709_v18 = vadd.f32 %v636_v17, %v597_v15  ;;  %v708_v20 = vadd.f32 %v631_v19, %v596_v16 }
 0x118   :  { %v725_v23 = vmul.f32 %v1326_v32, %v709_v18  ;;  %v724_v26 = vmul.f32 %v1326_v32, %v708_v20 }
 0x119   :  { %v676_v27 = vpop.permute.xlu1 %675  ;;  %v671_v30 = vpop.permute.xlu0 %670 }
 0x11a   :  { %v741_v28 = vand.u32 2147483647, %v725_v23  ;;  %v740_v35 = vand.u32 2147483647, %v724_v26  ;;  %v717_v36 = vadd.f32 %v676_v27, %v605_v21  ;;  %v716_v37 = vadd.f32 %v671_v30, %v604_v22 }
 0x11b   :  { %v1512_v26 = vmul.f32 %v1326_v32, %v1488_v11  ;;  %v600_v27 = vmul.f32 %v1326_v32, %v1490_v12 }
 0x11c   :  { %v757_v43 = vadd.f32 1.0, %v741_v28  ;;  %v756_v44 = vadd.f32 1.0, %v740_v35  ;;  %v733_v45 = vmul.f32 %v1326_v32, %v717_v36  ;;  %v732_v33 = vmul.f32 %v1326_v32, %v716_v37 }
 0x11d   :  { %v641_v47 = vpop.permute.xlu1 %640  ;;  %v579_v48 = vpop.permute.xlu0 %578 }
 0x11e   :  { %1014 = vrcp.f32 %v757_v43  ;;  %v749_v51 = vand.u32 2147483647, %v733_v45  ;;  %v748_v41 = vand.u32 2147483647, %v732_v33  ;;  %v710_v53 = vadd.f32 %v641_v47, %v598_v38 }
 0x11f   :  { %1016 = vrcp.f32 %v756_v44  ;;  %v608_v36 = vmul.f32 %v1326_v32, %v579_v48 }
 0x120   :  { %v765_v55 = vadd.f32 1.0, %v749_v51  ;;  %v764_v56 = vadd.f32 1.0, %v748_v41  ;;  %v726_v50 = vmul.f32 %v1326_v32, %v710_v53 }
 0x121   :  { %v584_v60 = vpop.permute.xlu1 %583  ;;  %v681_v61 = vpop.permute.xlu0 %680 }
 0x122   :  { %1018 = vrcp.f32 %v765_v55  ;;  %v742_v62 = vand.u32 2147483647, %v726_v50  ;;  %v718_v0 = vadd.f32 %v681_v61, %v606_v54  ;;  %v609_v44 = vmul.f32 %v1326_v32, %v584_v60 }
 0x123   :  { %1020 = vrcp.f32 %v764_v56 }
 0x124   :  { %v758_v4 = vadd.f32 1.0, %v742_v62  ;;  %v734_v1 = vmul.f32 %v1326_v32, %v718_v0 }
 0x125   :  { %v686_v7 = vpop.permute.xlu1 %685  ;;  %v646_v8 = vpop.permute.xlu0 %645 }
 0x126   :  { %1022 = vrcp.f32 %v758_v4  ;;  %v750_v9 = vand.u32 2147483647, %v734_v1  ;;  %v719_v13 = vadd.f32 %v686_v7, %v607_v58  ;;  %v711_v14 = vadd.f32 %v646_v8, %v599_v3 }
 0x128   :  { %v1015_v15 = vpop.eup %1014  ;;  %v766_v16 = vadd.f32 1.0, %v750_v9  ;;  %v735_v17 = vmul.f32 %v1326_v32, %v719_v13  ;;  %v727_v19 = vmul.f32 %v1326_v32, %v711_v14 }
 0x129   :  { %v1017_v18 = vpop.eup %1016  ;;  %v789_v2 = vmul.f32 %v1015_v15, %v1442_v24  ;;  %v589_v20 = vpop.permute.xlu1 %588 }
 0x12a   :  { %v549_v10 = vpop.permute.xlu0 %548  ;;  %v788_v21 = vmul.f32 %v1017_v18, %v1444_v25  ;;  %1024 = vrcp.f32 %v766_v16  ;;  %v751_v22 = vand.u32 2147483647, %v735_v17  ;;  %v743_v23 = vand.u32 2147483647, %v727_v19 }
 0x12b   :  { %v810_v30 = vrot.slane %v789_v2, 4  ;;  %v1520_v11 = vmul.f32 %v1326_v32, %v589_v20 }
 0x12c   :  { %v1019_v28 = vpop.eup %1018  ;;  %v804_v35 = vrot.slane %v788_v21, 4  ;;  %v767_v24 = vadd.f32 1.0, %v751_v22  ;;  %v759_v37 = vadd.f32 1.0, %v743_v23 }
 0x12d   :  { %v1021_v38 = vpop.eup %1020  ;;  %v811_v43 = vadd.f32 %v810_v30, %v789_v2  ;;  %v797_v25 = vmul.f32 %v1019_v28, %v1466_v42  ;;  %v691_v45 = vpop.permute.xlu1 %690  ;;  %v1524_v42 = vmul.f32 %v1326_v32, %v549_v10 }
 0x12e   :  { %v651_v33 = vpop.permute.xlu0 %650  ;;  %v805_v12 = vadd.f32 %v804_v35, %v788_v21  ;;  %v796_v47 = vmul.f32 %v1021_v38, %v1468_v52  ;;  %1026 = vrcp.f32 %v767_v24  ;;  %v720_v51 = vadd.f32 %v691_v45, %v608_v36 }
 0x12f   :  { %v812_v48 = vrot.slane %v811_v43, 2  ;;  %v858_v41 = vrot.slane %v797_v25, 4  ;;  %1028 = vrcp.f32 %v759_v37  ;;  %v712_v53 = vadd.f32 %v651_v33, %v600_v27 }
 0x130   :  { %v1023_v54 = vpop.eup %1022  ;;  %v806_v55 = vrot.slane %v805_v12, 2  ;;  %v852_v56 = vrot.slane %v796_v47, 4  ;;  %v736_v50 = vmul.f32 %v1326_v32, %v720_v51 }
 0x131   :  { %v813_v60 = vadd.f32 %v812_v48, %v811_v43  ;;  %v859_v61 = vadd.f32 %v858_v41, %v797_v25  ;;  %v790_v62 = vmul.f32 %v1023_v54, %v1450_v31  ;;  %v728_v52 = vmul.f32 %v1326_v32, %v712_v53  ;;  %v594_v0 = vpop.permute.xlu1 %593 }
 0x132   :  { %v554_v3 = vpop.permute.xlu0 %553  ;;  %v807_v58 = vadd.f32 %v806_v55, %v805_v12  ;;  %v853_v4 = vadd.f32 %v852_v56, %v796_v47  ;;  %v752_v1 = vand.u32 2147483647, %v736_v50  ;;  %v1530_v7 = vmul.f32 %v1326_v32, %v594_v0 }
 0x133   :  { %v814_v8 = vrot.slane %v813_v60, 1  ;;  %v860_v9 = vrot.slane %v859_v61, 2  ;;  %v816_v13 = vrot.slane %v790_v62, 4  ;;  %v744_v14 = vand.u32 2147483647, %v728_v52 }
 0x134   :  { %v1025_v15 = vpop.eup %1024  ;;  %v808_v16 = vrot.slane %v807_v58, 1  ;;  %v854_v17 = vrot.slane %v853_v4, 2  ;;  %v768_v19 = vadd.f32 1.0, %v752_v1  ;;  %v1533_v31 = vmul.f32 %v1326_v32, %v554_v3 }
 0x135   :  { %v815_v18 = vadd.f32 %v814_v8, %v813_v60  ;;  %v861_v2 = vadd.f32 %v860_v9, %v859_v61  ;;  %v817_v20 = vadd.f32 %v816_v13, %v790_v62  ;;  %v798_v10 = vmul.f32 %v1025_v15, %v1474_v59  ;;  %v696_v21 = vpop.permute.xlu1 %695 }
 0x136   :  { %v656_v22 = vpop.permute.xlu0 %655  ;;  %v809_v23 = vadd.f32 %v808_v16, %v807_v58  ;;  %v855_v27 = vadd.f32 %v854_v17, %v853_v4  ;;  %1030 = vrcp.f32 %v768_v19  ;;  %v760_v30 = vadd.f32 1.0, %v744_v14 }
 0x137   :  { %v862_v28 = vrot.slane %v861_v2, 1  ;;  %v818_v35 = vrot.slane %v817_v20, 2  ;;  %v864_v36 = vrot.slane %v798_v10, 4  ;;  %v721_v24 = vadd.f32 %v696_v21, %v609_v44 }
 0x138   :  { %v1027_v37 = vpop.eup %1026  ;;  %v917_v38 = vsel %vm916_vm0, %v815_v18, %v809_v23  ;;  %v856_v43 = vrot.slane %v855_v27, 1  ;;  %1032 = vrcp.f32 %v760_v30  ;;  %v713_v25 = vadd.f32 %v656_v22, %v1512_v26 }
 0x139   :  { %v1029_v45 = vpop.eup %1028  ;;  %v863_v33 = vadd.f32 %v862_v28, %v861_v2  ;;  %v819_v59 = vadd.f32 %v818_v35, %v817_v20  ;;  %v865_v12 = vadd.f32 %v864_v36, %v798_v10  ;;  %v799_v47 = vmul.f32 %v1027_v37, %v1472_v49  ;;  %v701_v51 = vpop.permute.xlu1 %700 }
 0x13a   :  { %v857_v48 = vadd.f32 %v856_v43, %v855_v27  ;;  %v791_v41 = vmul.f32 %v1029_v45, %v1448_v29  ;;  %v737_v53 = vmul.f32 %v1326_v32, %v721_v24  ;;  %v729_v44 = vmul.f32 %v1326_v32, %v713_v25  ;;  %v661_v26 = vpop.permute.xlu0 %660 }
 0x13b   :  { %v820_v54 = vrot.slane %v819_v59, 1  ;;  %v866_v55 = vrot.slane %v865_v12, 2  ;;  %v870_v56 = vrot.slane %v799_v47, 4  ;;  %v722_v50 = vadd.f32 %v701_v51, %v1520_v11 }
 0x13c   :  { %v930_v60 = vsel %vm916_vm0, %v863_v33, %v857_v48  ;;  %v822_v61 = vrot.slane %v791_v41, 4  ;;  %v753_v62 = vand.u32 2147483647, %v737_v53  ;;  %v745_v49 = vand.u32 2147483647, %v729_v44 }
 0x13d   :  { %v821_v52 = vadd.f32 %v820_v54, %v819_v59  ;;  %v867_v0 = vadd.f32 %v866_v55, %v865_v12  ;;  %v871_v3 = vadd.f32 %v870_v56, %v799_v47  ;;  %v738_v29 = vmul.f32 %v1326_v32, %v722_v50  ;;  %v706_v58 = vpop.permute.xlu1 %705 }
 0x13e   :  { %v823_v4 = vadd.f32 %v822_v61, %v791_v41  ;;  %v769_v1 = vadd.f32 1.0, %v753_v62  ;;  %v761_v8 = vadd.f32 1.0, %v745_v49  ;;  %v714_v9 = vadd.f32 %v661_v26, %v1524_v42  ;;  %v666_v30 = vpop.permute.xlu0 %665 }
 0x13f   :  { %v919_v11 = vsel %vm918_vm1, %v821_v52, %v917_v38  ;;  %v868_v13 = vrot.slane %v867_v0, 1  ;;  %v872_v14 = vrot.slane %v871_v3, 2  ;;  %v754_v15 = vand.u32 2147483647, %v738_v29 }
 0x140   :  { %v1031_v16 = vpop.eup %1030  ;;  %v824_v17 = vrot.slane %v823_v4, 2  ;;  %1034 = vrcp.f32 %v769_v1  ;;  %v730_v19 = vmul.f32 %v1326_v32, %v714_v9  ;;  %v723_v18 = vadd.f32 %v706_v58, %v1530_v7 }
 0x141   :  { %v869_v2 = vadd.f32 %v868_v13, %v867_v0  ;;  %v873_v20 = vadd.f32 %v872_v14, %v871_v3  ;;  %v800_v10 = vmul.f32 %v1031_v16, %v1480_v57  ;;  %1036 = vrcp.f32 %v761_v8 }
 0x142   :  { %v1033_v21 = vpop.eup %1032  ;;  %v825_v22 = vadd.f32 %v824_v17, %v823_v4  ;;  %v770_v42 = vadd.f32 1.0, %v754_v15  ;;  %v746_v23 = vand.u32 2147483647, %v730_v19  ;;  %v739_v27 = vmul.f32 %v1326_v32, %v723_v18 }
 0x143   :  { %v931_v28 = vsel %vm918_vm1, %v869_v2, %v930_v60  ;;  %v874_v35 = vrot.slane %v873_v20, 1  ;;  %v876_v36 = vrot.slane %v800_v10, 4  ;;  %v792_v24 = vmul.f32 %v1033_v21, %v1456_v40 }
 0x144   :  { %v826_v37 = vrot.slane %v825_v22, 1  ;;  %1038 = vrcp.f32 %v770_v42  ;;  %v762_v7 = vadd.f32 1.0, %v746_v23  ;;  %v755_v38 = vand.u32 2147483647, %v739_v27 }
 0x145   :  { %v875_v43 = vadd.f32 %v874_v35, %v873_v20  ;;  %v877_v57 = vadd.f32 %v876_v36, %v800_v10  ;;  %v828_v25 = vrot.slane %v792_v24, 4  ;;  %v715_v45 = vadd.f32 %v666_v30, %v1533_v31 }
 0x146   :  { %v827_v33 = vadd.f32 %v826_v37, %v825_v22  ;;  %1040 = vrcp.f32 %v762_v7  ;;  %v771_v59 = vadd.f32 1.0, %v755_v38 }
 0x147   :  { %v932_v12 = vsel %vm920_vm2, %v875_v43, %v931_v28  ;;  %v878_v47 = vrot.slane %v877_v57, 2  ;;  %v829_v51 = vadd.f32 %v828_v25, %v792_v24  ;;  %v731_v48 = vmul.f32 %v1326_v32, %v715_v45 }
 0x148   :  { %v921_v40 = vsel %vm920_vm2, %v827_v33, %v919_v11  ;;  %1042 = vrcp.f32 %v771_v59 }
 0x149   :  { %v879_v41 = vadd.f32 %v878_v47, %v877_v57  ;;  %v830_v53 = vrot.slane %v829_v51, 2  ;;  %v747_v44 = vand.u32 2147483647, %v731_v48 }
 0x14a   :  { %v1035_v54 = vpop.eup %1034 }
 0x14b   :  { %v1037_v55 = vpop.eup %1036  ;;  %v880_v56 = vrot.slane %v879_v41, 1  ;;  %v831_v50 = vadd.f32 %v830_v53, %v829_v51  ;;  %v801_v31 = vmul.f32 %v1035_v54, %v1478_v63  ;;  %v763_v26 = vadd.f32 1.0, %v747_v44 }
 0x14c   :  { %v793_v60 = vmul.f32 %v1037_v55, %v1454_v39 }
 0x14d   :  { %v881_v61 = vadd.f32 %v880_v56, %v879_v41  ;;  %v832_v62 = vrot.slane %v831_v50, 1  ;;  %v882_v49 = vrot.slane %v801_v31, 4  ;;  %1044 = vrcp.f32 %v763_v26 }
 0x14e   :  { %v1039_v32 = vpop.eup %1038  ;;  %v834_v52 = vrot.slane %v793_v60, 4 }
 0x14f   :  { %v933_v0 = vsel %vm922_vm3, %v881_v61, %v932_v12  ;;  %v833_v3 = vadd.f32 %v832_v62, %v831_v50  ;;  %v883_v29 = vadd.f32 %v882_v49, %v801_v31  ;;  %v802_v58 = vmul.f32 %v1039_v32, %v1486_v6 }
 0x150   :  { %v1041_v4 = vpop.eup %1040  ;;  %v835_v1 = vadd.f32 %v834_v52, %v793_v60 }
 0x151   :  { %v923_v8 = vsel %vm922_vm3, %v833_v3, %v921_v40  ;;  %v884_v9 = vrot.slane %v883_v29, 2  ;;  %v888_v63 = vrot.slane %v802_v58, 4  ;;  %v794_v11 = vmul.f32 %v1041_v4, %v1462_v46 }
 0x152   :  { %v1043_v13 = vpop.eup %1042  ;;  %v836_v39 = vrot.slane %v835_v1, 2 }
 0x153   :  { %v885_v14 = vadd.f32 %v884_v9, %v883_v29  ;;  %v889_v15 = vadd.f32 %v888_v63, %v802_v58  ;;  %v840_v16 = vrot.slane %v794_v11, 4  ;;  %v803_v17 = vmul.f32 %v1043_v13, %v1484_v5 }
 0x154   :  { %v837_v19 = vadd.f32 %v836_v39, %v835_v1 }
 0x155   :  { %v886_v18 = vrot.slane %v885_v14, 1  ;;  %v890_v2 = vrot.slane %v889_v15, 2  ;;  %v841_v20 = vadd.f32 %v840_v16, %v794_v11  ;;  %v894_v10 = vrot.slane %v803_v17, 4 }
 0x156   :  { %v838_v6 = vrot.slane %v837_v19, 1 }
 0x157   :  { %v1045_v21 = vpop.eup %1044  ;;  %v887_v22 = vadd.f32 %v886_v18, %v885_v14  ;;  %v891_v42 = vadd.f32 %v890_v2, %v889_v15  ;;  %v842_v23 = vrot.slane %v841_v20, 2  ;;  %v895_v27 = vadd.f32 %v894_v10, %v803_v17 }
 0x158   :  { %v839_v46 = vadd.f32 %v838_v6, %v837_v19  ;;  %v795_v30 = vmul.f32 %v1045_v21, %v1460_v34 }
 0x159   :  { %v934_v28 = vsel %vm924_vm4, %v887_v22, %v933_v0  ;;  %v892_v35 = vrot.slane %v891_v42, 1  ;;  %v843_v36 = vadd.f32 %v842_v23, %v841_v20  ;;  %v896_v24 = vrot.slane %v895_v27, 2 }
 0x15a   :  { %v925_v5 = vsel %vm924_vm4, %v839_v46, %v923_v8  ;;  %v846_v37 = vrot.slane %v795_v30, 4 }
 0x15b   :  { %v893_v7 = vadd.f32 %v892_v35, %v891_v42  ;;  %v844_v38 = vrot.slane %v843_v36, 1  ;;  %v897_v43 = vadd.f32 %v896_v24, %v895_v27 }
 0x15c   :  { %v847_v57 = vadd.f32 %v846_v37, %v795_v30 }
 0x15d   :  { %v935_v25 = vsel %vm926_vm5, %v893_v7, %v934_v28  ;;  %v845_v45 = vadd.f32 %v844_v38, %v843_v36  ;;  %v898_v33 = vrot.slane %v897_v43, 1 }
 0x15e   :  { %v848_v59 = vrot.slane %v847_v57, 2 }
 0x15f   :  { %v927_v12 = vsel %vm926_vm5, %v845_v45, %v925_v5  ;;  %v899_v47 = vadd.f32 %v898_v33, %v897_v43 }
 0x160   :  { %v849_v51 = vadd.f32 %v848_v59, %v847_v57 }
 0x161   :  { %v936_v34 = vsel %vm928_vm6, %v899_v47, %v935_v25 }
 0x162   :  { %940 = vst [vmem:[%s1572_s3 + $0x8] sm:$0xff] %v936_v34  ;;  %v850_v48 = vrot.slane %v849_v51, 1 }
 0x164   :  { %v851_v40 = vadd.f32 %v850_v48, %v849_v51 }
 0x166   :  { %v929_v41 = vsel %vm928_vm6, %v851_v40, %v927_v12 }
 0x167   :  { %939 = vst [vmem:[%s1572_s3] sm:$0xff] %v929_v41 }

</bundles_post_ra>
